<compile_context>
chip_gen: v7x
topology: tpu7x:2x2x1
jax: 0.10.0
libtpu: 0.0.40
codegen_flags: <defaults>
</compile_context>

<pallas_src>
import jax
import jax.numpy as jnp
from jax.experimental import pallas as pl
from jax.experimental.pallas import tpu as pltpu

# ---- hyper-parameters of the criterion (deterministic, from __init__) ----
GAMMA = 2.0     # focal loss gamma
ALPHA = 0.25    # focal loss alpha
SIGMA = 3.0     # SmoothL1 sigma

# Kernel specializes pow(pt, GAMMA) as pt*pt; guard against silent drift.
assert GAMMA == 2.0, "Pallas kernel hard-codes focal gamma == 2.0 (pt*pt)"


# --------------------------------------------------------------------------
# Fused kernel:
#   loss_ce   : sigmoid focal classification loss (sum / num_boxes)
#   loss_bbox : code_weights * delta, sigma-SmoothL1 (sum / num_boxes)
#   loc_loss_elem : per-element SmoothL1 / num_boxes, natural [N, CODE]
# --------------------------------------------------------------------------
def _set_crit_kernel(num_boxes_ref, logits_ref, gt_ref, cls_ref, delta_ref,
                     codew_ref, ce_ref, bbox_ref, elem_ref):
    # one scalar reciprocal; all per-element divides become multiplies
    inv_nb = 1.0 / num_boxes_ref[0]

    # -------- sigmoid focal classification loss, [B*C, Q] (Q on lanes) -----
    x = logits_ref[...]                                  # [BC, Q] f32
    m = gt_ref[...] == cls_ref[...]                      # bool one-hot (bg col dropped)

    e = jnp.exp(-jnp.abs(x))                             # shared EUP exp
    inv1pe = pl.reciprocal(1.0 + e, approx=True)         # EUP vrcp (VALU-free)
    sig = jnp.where(x >= 0.0, inv1pe, e * inv1pe)        # overflow-free sigmoid
    alpha_w = jnp.where(m, ALPHA, 1.0 - ALPHA)
    pt = jnp.where(m, 1.0 - sig, sig)
    focal_w = alpha_w * (pt * pt)                        # gamma == 2.0
    bce = jnp.maximum(x, 0.0) - jnp.where(m, x, 0.0) + jnp.log1p(e)
    ce_ref[0, 0] = jnp.sum(focal_w * bce) * inv_nb

    # -------- sigma SmoothL1 box loss, natural [N, CODE] layout ------------
    d = delta_ref[...] * codew_ref[...]                  # [N,CODE] * [1,CODE]
    abs_d = jnp.abs(d)
    sig2 = SIGMA * SIGMA
    cut = 1.0 / sig2
    loss = jnp.where(abs_d < cut, (0.5 * sig2) * d * d, abs_d - 0.5 * cut)
    bbox_ref[0, 0] = jnp.sum(loss) * inv_nb
    elem_ref[...] = loss * inv_nb


def set_criterion_losses(pred_logits, gt_classes, delta, code_weights, num_boxes):
    """Runs the fused Pallas kernel. Layout plumbing lives here in plain JAX."""
    B, Q, C = pred_logits.shape
    N, CODE = delta.shape
    BC = B * C

    logits_flat = jnp.transpose(pred_logits, (0, 2, 1)).reshape(BC, Q)   # [BC, Q]
    gt_rep = jnp.repeat(gt_classes.astype(jnp.int32), C, axis=0)         # [BC, Q]
    cls_col = jnp.tile(jnp.arange(1, C + 1, dtype=jnp.int32), B).reshape(BC, 1)
    codew_row = code_weights.reshape(1, CODE)                            # [1, CODE]

    loss_ce, loss_bbox, elem = pl.pallas_call(
        _set_crit_kernel,
        out_shape=(
            jax.ShapeDtypeStruct((1, 1), jnp.float32),        # loss_ce
            jax.ShapeDtypeStruct((1, 1), jnp.float32),        # loss_bbox
            jax.ShapeDtypeStruct((N, CODE), jnp.float32),     # loc_loss_elem
        ),
        in_specs=[
            pl.BlockSpec(memory_space=pltpu.SMEM),            # num_boxes [1]
            pl.BlockSpec((BC, Q), lambda: (0, 0)),            # logits  (lane-dense)
            pl.BlockSpec((BC, Q), lambda: (0, 0)),            # gt classes broadcast
            pl.BlockSpec((BC, 1), lambda: (0, 0)),            # class-id column
            pl.BlockSpec((N, CODE), lambda: (0, 0)),          # raw delta
            pl.BlockSpec((1, CODE), lambda: (0, 0)),          # code_weights row
        ],
        out_specs=(
            pl.BlockSpec(memory_space=pltpu.SMEM),
            pl.BlockSpec(memory_space=pltpu.SMEM),
            pl.BlockSpec((N, CODE), lambda: (0, 0)),
        ),
    )(num_boxes, logits_flat, gt_rep, cls_col, delta, codew_row)

    return loss_ce[0, 0], loss_bbox[0, 0], elem


# --------------------------------------------------------------------------
# SetCriterion forward (glue in plain JAX around the fused Pallas kernel)
# --------------------------------------------------------------------------
def set_criterion_forward(pred_dicts, gt_dicts, weight_dict, code_weights):
    pred_logits = pred_dicts["pred_logits"]        # [B, Q, C]
    pred_boxes = pred_dicts["pred_boxes"]          # [B, Q, CODE]
    gt_boxes_list = gt_dicts["gt_boxes"]           # list of [n_b, CODE]
    gt_classes_list = gt_dicts["gt_classes"]       # list of [n_b] int32 in [0, C)
    B, Q, C = pred_logits.shape

    # --- synthetic identity matcher: query i <-> gt i for each batch ---
    # TODO(synk): real Hungarian matcher lives in an external module.
    ns = [int(g.shape[0]) for g in gt_classes_list]
    batch_idx = jnp.concatenate(
        [jnp.full((n,), i, dtype=jnp.int32) for i, n in enumerate(ns)])
    src_idx = jnp.concatenate(
        [jnp.arange(n, dtype=jnp.int32) for n in ns])

    pred_boxes_m = pred_boxes[batch_idx, src_idx]              # [N, CODE]
    gt_boxes_m = jnp.concatenate(gt_boxes_list, axis=0)        # [N, CODE]

    # synthetic box_coder.get_delta (residual coder): gt - pred
    # TODO(synk): box_coder.get_delta / decode variants not translated.
    delta = gt_boxes_m - pred_boxes_m                          # [N, CODE]

    # dense per-query class targets (0 == background, 1..C foreground)
    gt_classes_pos = jnp.concatenate(gt_classes_list, axis=0).astype(jnp.int32) + 1
    gt_classes = jnp.zeros((B, Q), dtype=jnp.int32).at[batch_idx, src_idx].set(
        gt_classes_pos)

    num_boxes_f = max(float(sum(ns)), 1.0)                     # world_size == 1
    num_boxes = jnp.asarray([num_boxes_f], dtype=jnp.float32)

    # --- losses (one fused Pallas kernel) ---
    loss_ce, loss_bbox, loc_loss_elem = set_criterion_losses(
        pred_logits, gt_classes, delta, code_weights, num_boxes)

    losses = {
        "loss_ce": loss_ce,
        "loss_bbox": loss_bbox,
        "loc_loss_elem": loc_loss_elem,
    }
    total = sum(losses[k] * weight_dict[k] for k in losses if k in weight_dict)
    losses["loss"] = total
    return losses


# --------------------------------------------------------------------------
# Pure-JAX reference for a tolerance check
# --------------------------------------------------------------------------
def _reference_losses(pred_logits, gt_classes, delta, code_weights, num_boxes):
    B, Q, C = pred_logits.shape
    t = jax.nn.one_hot(gt_classes, C + 1, dtype=jnp.float32)[..., 1:]
    x = pred_logits
    sig = jax.nn.sigmoid(x)
    alpha_w = t * ALPHA + (1.0 - t) * (1.0 - ALPHA)
    pt = t * (1.0 - sig) + (1.0 - t) * sig
    focal_w = alpha_w * pt ** GAMMA
    bce = jnp.maximum(x, 0.0) - x * t + jnp.log1p(jnp.exp(-jnp.abs(x)))
    loss_ce = jnp.sum(focal_w * bce) / num_boxes
    d = delta * code_weights[None, :]
    abs_d = jnp.abs(d)
    sig2 = SIGMA * SIGMA
    elem = jnp.where(abs_d < 1.0 / sig2, 0.5 * sig2 * d * d, abs_d - 0.5 / sig2)
    loss_bbox = jnp.sum(elem) / num_boxes
    return loss_ce, loss_bbox, elem / num_boxes


if __name__ == "__main__":
    key = jax.random.PRNGKey(0)
    B, Q, C, CODE = 2, 16, 3, 8
    n_gt = [4, 4]

    k1, k2, k3, k4 = jax.random.split(key, 4)
    pred_logits = jax.random.normal(k1, (B, Q, C), dtype=jnp.float32)
    pred_boxes = jax.random.normal(k2, (B, Q, CODE), dtype=jnp.float32)
    gt_boxes_list = [
        jax.random.normal(jax.random.fold_in(k3, i), (n, CODE), dtype=jnp.float32)
        for i, n in enumerate(n_gt)
    ]
    gt_classes_list = [
        jax.random.randint(jax.random.fold_in(k4, i), (n,), 0, C, dtype=jnp.int32)
        for i, n in enumerate(n_gt)
    ]

    code_weights = jnp.array([1.0, 1.0, 1.0, 1.0, 1.0, 1.0, 0.5, 0.5],
                             dtype=jnp.float32)
    weight_dict = {"loss_ce": 1.0, "loss_bbox": 2.0}

    pred_dicts = {"pred_logits": pred_logits, "pred_boxes": pred_boxes}
    gt_dicts = {"gt_boxes": gt_boxes_list, "gt_classes": gt_classes_list}

    losses = set_criterion_forward(pred_dicts, gt_dicts, weight_dict, code_weights)
    jax.block_until_ready(losses["loss"])
    jax.block_until_ready(losses["loc_loss_elem"])

    # --- tolerance check against a pure-JAX reference (approx rcp ~1e-3) ---
    batch_idx = jnp.concatenate(
        [jnp.full((n,), i, dtype=jnp.int32) for i, n in enumerate(n_gt)])
    src_idx = jnp.concatenate([jnp.arange(n, dtype=jnp.int32) for n in n_gt])
    gt_classes_pos = jnp.concatenate(gt_classes_list).astype(jnp.int32) + 1
    gt_classes_ref = jnp.zeros((B, Q), jnp.int32).at[batch_idx, src_idx].set(gt_classes_pos)
    delta_ref = jnp.concatenate(gt_boxes_list, 0) - pred_boxes[batch_idx, src_idx]
    nb = max(float(sum(n_gt)), 1.0)
    ce_r, bb_r, el_r = _reference_losses(pred_logits, gt_classes_ref, delta_ref,
                                         code_weights, nb)
    assert jnp.allclose(losses["loss_ce"], ce_r, rtol=1e-2, atol=1e-5)
    assert jnp.allclose(losses["loss_bbox"], bb_r, rtol=1e-2, atol=1e-5)
    assert jnp.allclose(losses["loc_loss_elem"], el_r, rtol=1e-2, atol=1e-5)

    print("KERNEL_OK")
</pallas_src>

<mosaic_0001>
module attributes {stable_mosaic.version = 11 : i64} {
  func.func @_set_crit_kernel(%arg0: memref<1xf32, #tpu.memory_space<smem>>, %arg1: memref<6x16xf32, #tpu.memory_space<vmem>>, %arg2: memref<6x16xi32, #tpu.memory_space<vmem>>, %arg3: memref<6x1xi32, #tpu.memory_space<vmem>>, %arg4: memref<8x8xf32, #tpu.memory_space<vmem>>, %arg5: memref<1x8xf32, #tpu.memory_space<vmem>>, %arg6: memref<1x1xf32, #tpu.memory_space<smem>>, %arg7: memref<1x1xf32, #tpu.memory_space<smem>>, %arg8: memref<8x8xf32, #tpu.memory_space<vmem>>) attributes {dimension_semantics = [], scalar_prefetch = 0 : i64, scratch_operands = 0 : i64, tpu.core_type = #tpu.core_type<tc>} {
    %c0 = arith.constant 0 : index
    %0 = memref.load %arg0[%c0] : memref<1xf32, #tpu.memory_space<smem>>
    %cst = arith.constant 1.000000e+00 : f32
    %1 = arith.divf %cst, %0 : f32
    %c0_0 = arith.constant 0 : index
    %c0_1 = arith.constant 0 : index
    %2 = vector.load %arg1[%c0_0, %c0_1] : memref<6x16xf32, #tpu.memory_space<vmem>>, vector<6x16xf32>
    %c0_2 = arith.constant 0 : index
    %c0_3 = arith.constant 0 : index
    %3 = vector.load %arg2[%c0_2, %c0_3] : memref<6x16xi32, #tpu.memory_space<vmem>>, vector<6x16xi32>
    %c0_4 = arith.constant 0 : index
    %c0_5 = arith.constant 0 : index
    %4 = vector.load %arg3[%c0_4, %c0_5] : memref<6x1xi32, #tpu.memory_space<vmem>>, vector<6x1xi32>
    %5 = vector.broadcast %4 : vector<6x1xi32> to vector<6x16xi32>
    %6 = arith.cmpi eq, %3, %5 : vector<6x16xi32>
    %7 = math.absf %2 : vector<6x16xf32>
    %cst_6 = arith.constant 0.000000e+00 : f32
    %8 = vector.broadcast %cst_6 : f32 to vector<6x16xf32>
    %9 = arith.subf %8, %7 : vector<6x16xf32>
    %10 = math.exp %9 : vector<6x16xf32>
    %cst_7 = arith.constant 1.000000e+00 : f32
    %11 = vector.broadcast %cst_7 : f32 to vector<6x16xf32>
    %12 = arith.addf %11, %10 : vector<6x16xf32>
    %13 = tpu.reciprocal %12 {approx = true} : vector<6x16xf32> -> vector<6x16xf32>
    %cst_8 = arith.constant 0.000000e+00 : f32
    %14 = vector.broadcast %cst_8 : f32 to vector<6x16xf32>
    %15 = arith.cmpf oge, %2, %14 : vector<6x16xf32>
    %16 = arith.mulf %10, %13 : vector<6x16xf32>
    %17 = arith.select %15, %13, %16 : vector<6x16xi1>, vector<6x16xf32>
    %cst_9 = arith.constant 2.500000e-01 : f32
    %cst_10 = arith.constant 7.500000e-01 : f32
    %18 = vector.broadcast %cst_9 : f32 to vector<6x16xf32>
    %19 = vector.broadcast %cst_10 : f32 to vector<6x16xf32>
    %20 = arith.select %6, %18, %19 : vector<6x16xi1>, vector<6x16xf32>
    %cst_11 = arith.constant 1.000000e+00 : f32
    %21 = vector.broadcast %cst_11 : f32 to vector<6x16xf32>
    %22 = arith.subf %21, %17 : vector<6x16xf32>
    %23 = arith.select %6, %22, %17 : vector<6x16xi1>, vector<6x16xf32>
    %24 = arith.mulf %23, %23 : vector<6x16xf32>
    %25 = arith.mulf %20, %24 : vector<6x16xf32>
    %cst_12 = arith.constant 0.000000e+00 : f32
    %26 = vector.broadcast %cst_12 : f32 to vector<6x16xf32>
    %27 = arith.maximumf %2, %26 : vector<6x16xf32>
    %cst_13 = arith.constant 0.000000e+00 : f32
    %28 = vector.broadcast %cst_13 : f32 to vector<6x16xf32>
    %29 = arith.select %6, %2, %28 : vector<6x16xi1>, vector<6x16xf32>
    %30 = arith.subf %27, %29 : vector<6x16xf32>
    %31 = math.log1p %10 : vector<6x16xf32>
    %32 = arith.addf %30, %31 : vector<6x16xf32>
    %33 = arith.mulf %25, %32 : vector<6x16xf32>
    %34 = vector.shape_cast %33 : vector<6x16xf32> to vector<1x6x16xf32>
    %cst_14 = arith.constant dense<0.000000e+00> : vector<1xf32>
    %35 = vector.multi_reduction <add>, %34, %cst_14 [1, 2] : vector<1x6x16xf32> to vector<1xf32>
    %36 = vector.shape_cast %35 : vector<1xf32> to vector<1x1x1xf32>
    %37 = vector.extract %36[0, 0, 0] : f32 from vector<1x1x1xf32>
    %38 = arith.mulf %37, %1 : f32
    %c0_15 = arith.constant 0 : index
    %c0_16 = arith.constant 0 : index
    %39 = memref.load %arg6[%c0_15, %c0_16] : memref<1x1xf32, #tpu.memory_space<smem>>
    memref.store %38, %arg6[%c0_15, %c0_16] : memref<1x1xf32, #tpu.memory_space<smem>>
    %c0_17 = arith.constant 0 : index
    %c0_18 = arith.constant 0 : index
    %40 = vector.load %arg4[%c0_17, %c0_18] : memref<8x8xf32, #tpu.memory_space<vmem>>, vector<8x8xf32>
    %c0_19 = arith.constant 0 : index
    %c0_20 = arith.constant 0 : index
    %41 = vector.load %arg5[%c0_19, %c0_20] : memref<1x8xf32, #tpu.memory_space<vmem>>, vector<1x8xf32>
    %42 = vector.broadcast %41 : vector<1x8xf32> to vector<8x8xf32>
    %43 = arith.mulf %40, %42 : vector<8x8xf32>
    %44 = math.absf %43 : vector<8x8xf32>
    %cst_21 = arith.constant 0.111111112 : f32
    %45 = vector.broadcast %cst_21 : f32 to vector<8x8xf32>
    %46 = arith.cmpf olt, %44, %45 : vector<8x8xf32>
    %cst_22 = arith.constant 4.500000e+00 : f32
    %47 = vector.broadcast %cst_22 : f32 to vector<8x8xf32>
    %48 = arith.mulf %47, %43 : vector<8x8xf32>
    %49 = arith.mulf %48, %43 : vector<8x8xf32>
    %cst_23 = arith.constant 0.055555556 : f32
    %50 = vector.broadcast %cst_23 : f32 to vector<8x8xf32>
    %51 = arith.subf %44, %50 : vector<8x8xf32>
    %52 = arith.select %46, %49, %51 : vector<8x8xi1>, vector<8x8xf32>
    %53 = vector.shape_cast %52 : vector<8x8xf32> to vector<1x8x8xf32>
    %cst_24 = arith.constant dense<0.000000e+00> : vector<1xf32>
    %54 = vector.multi_reduction <add>, %53, %cst_24 [1, 2] : vector<1x8x8xf32> to vector<1xf32>
    %55 = vector.shape_cast %54 : vector<1xf32> to vector<1x1x1xf32>
    %56 = vector.extract %55[0, 0, 0] : f32 from vector<1x1x1xf32>
    %57 = arith.mulf %56, %1 : f32
    %c0_25 = arith.constant 0 : index
    %c0_26 = arith.constant 0 : index
    %58 = memref.load %arg7[%c0_25, %c0_26] : memref<1x1xf32, #tpu.memory_space<smem>>
    memref.store %57, %arg7[%c0_25, %c0_26] : memref<1x1xf32, #tpu.memory_space<smem>>
    %59 = vector.broadcast %1 : f32 to vector<8x8xf32>
    %60 = arith.mulf %52, %59 : vector<8x8xf32>
    %c0_27 = arith.constant 0 : index
    %c0_28 = arith.constant 0 : index
    %61 = vector.load %arg8[%c0_27, %c0_28] : memref<8x8xf32, #tpu.memory_space<vmem>>, vector<8x8xf32>
    tpu.vector_store %arg8[%c0_27, %c0_28], %60 {strides = array<i32>} : memref<8x8xf32, #tpu.memory_space<vmem>>, vector<8x8xf32>,
    return
  }
}

</mosaic_0001>

<bundles_post_ra>
// kernel: tpu_custom_call.1
= control target key start
LH: loop header
LB: loop body
LE: loop exit
PB: predicated region body
PF: predicated region fallthrough
CT: control target
= control target key end

     0   :  { %15 = vsyncpa [#allocation5], 0  ;;  %s335_s0 = inlined_call_operand.<no memory space> [shape: f32[1], index: 0, kind: input, shape index: {}]   ;;  %s336_s1 = inlined_call_operand.vmem [shape: f32[6,16], index: 1, kind: input, shape index: {}]   ;;  %s337_s2 = inlined_call_operand.vmem [shape: s32[6,16], index: 2, kind: input, shape index: {}]   ;;  %s338_s3 = inlined_call_operand.vmem [shape: s32[6,1], index: 3, kind: input, shape index: {}]   ;;  %s339_s4 = inlined_call_operand.vmem [shape: f32[8,8], index: 4, kind: input, shape index: {}]   ;;  %s340_s5 = inlined_call_operand.vmem [shape: f32[1,8], index: 5, kind: input, shape index: {}]   ;;  %s341_s6 = inlined_call_operand.hbm [shape: f32[1,1], index: 6, kind: output, shape index: {0}]   ;;  %s342_s7 = inlined_call_operand.hbm [shape: f32[1,1], index: 7, kind: output, shape index: {1}]   ;;  %s343_s8 = inlined_call_operand.hbm [shape: f32[8,8], index: 8, kind: output, shape index: {2}]  }
   0x1   :  { %16 = vsyncpa [#allocation7], 0  ;;  %v36_v0 = vld [vmem:[%s338_s3] sm:$0x3f]  ;;  %v224_v1 = vmov 0  }
   0x2   :  { %167 = vset.pattern.permute.xlu0 %v224_v1  ;;  %v83_v2 = vld [vmem:[%s339_s4] sm:$0xff] }
   0x3   :  { %38 = vperm.xlu0 %167, %v36_v0   ;;  %v154_v3 = vld [vmem:[%s340_s5] ss:$0 sm:$0xff] }
   0x4   :  { %17 = vsyncpa [#allocation4], 0  ;;  %v91_v4 = vmul.f32 %v154_v3, %v83_v2  ;;  %vm98_vm1 = vcmask 64512   ;;  %v34_v11 = vld [vmem:[%s336_s1] sm:$0x3f]  ;;  %v225_v35 = vmov 0.75   ;;  %v31_v41 = vstv %s335_s0 }
   0x5   :  { %v41_v12 = vand.u32 2147483647, %v34_v11  ;;  %vm47_vm2 = vcmp.ge.f32.partialorder %v34_v11, 0.0  ;;  %v35_v24 = vld [vmem:[%s337_s2] sm:$0x3f]  ;;  %v55_v28 = vmax.f32 %v34_v11, 0.0 }
   0x6   :  { %v92_v5 = vand.u32 2147483647, %v91_v4  ;;  %v94_v6 = vmul.f32 4.5, %v91_v4  ;;  %vm69_vm5 = vcmask 128000   ;;  %s226_s13 = smov [#allocation8]  }
   0x7   :  { %v42_v13 = vsub.f32 0.0, %v41_v12  ;;  %s137_s14 = sshll.u32 %s226_s13, 4  ;;  %s138_s14 = int_to_ptr.vmem [resolvable:$true] %s137_s14 }
   0x8   :  { %vm93_vm0 = vcmp.lt.f32.partialorder %v92_v5, 0.11111111  ;;  %v95_v7 = vmul.f32 %v94_v6, %v91_v4  ;;  %v155_v8 = vadd.f32 -0.055555556, %v92_v5  ;;  %s176_s15 = scalar_lea.vmem %s138_s14, 128  ;;  %p181_p1 = scmp.lt.s32.totalorder %s138_s14, %s138_s14 }
   0x9   :  { %v43_v14 = vmul.f32 1.442695, %v42_v13  ;;  %p177_p0 = scmp.ne.s32.totalorder %s138_s14, %s176_s15  ;;  %p182_p2 = scmp.lt.s32.totalorder %s176_s15, %s176_s15 }
   0xa   :  { %v97_v9 = vsel %vm93_vm0, %v95_v7, %v155_v8 }
   0xb   :  { %v99_v10 = vsel %vm98_vm1, %v97_v9, 0.0  ;;  %168 = vpow2.f32 %v43_v14  ;;  %p183_p3 = por %p182_p2, %p181_p1 }
   0xc   :  { %100 = vadd.xlane.f32.xlu1 %v99_v10 }
   0xd   :  { %p184_p4 = pnand %p183_p3, %p177_p0 }
  0x15   :  { %v169_v15 = vpop.eup %168 }
  0x16   :  { %v45_v16 = vadd.f32 1.0, %v169_v15  ;;  %v61_v18 = vmul.f32 -0.5, %v169_v15  ;;  %v64_v23 = vand.u32 2147483647, %v169_v15 }
  0x18   :  { %170 = vrcp.f32 %v45_v16  ;;  %v62_v20 = vadd.f32 1.0, %v61_v18  ;;  %vm65_vm3 = vcmp.lt.f32.partialorder %v64_v23, 0.0004427343 }
  0x19   :  { %172 = vlog2.f32 %v45_v16 }
  0x1a   :  { %v63_v27 = vmul.f32 %v169_v15, %v62_v20  ;;  %174 = vrcp.f32 %v31_v41 }
  0x22   :  { %v171_v17 = vpop.eup %170 }
  0x23   :  { %v48_v19 = vmul.f32 %v171_v17, %v169_v15  ;;  %v173_v21 = vpop.eup %172 }
  0x24   :  { %v60_v26 = vmul.f32 0.6931472, %v173_v21  ;;  %v175_v42 = vpop.eup %174 }
  0x25   :  { %v49_v22 = vsel %vm47_vm2, %v171_v17, %v48_v19  ;;  %156 = vpush %v175_v42 }
  0x26   :  { %v51_v25 = vsub.f32 1.0, %v49_v22  ;;  %v66_v32 = vsel %vm65_vm3, %v63_v27, %v60_v26 }
  0x56   :  { %s293_s12 = spop %156 }
  0x57   :  { %v112_v43 = vstv %s293_s12 }
  0x58   :  { %v113_v44 = vmul.f32 %v112_v43, %v97_v9 }
  0x5a   :  { %114 = vst.msk [vmem:[#allocation8] sm:$0xff] %vm98_vm1, %v113_v44 }
  0x82   :  { %v39_v29 = vpop.permute.xlu0 %38 }
  0x83   :  { %vm40_vm4 = vcmp.eq.s32.totalorder %v35_v24, %v39_v29 }
  0x84   :  { %v52_v30 = vsel %vm40_vm4, %v51_v25, %v49_v22  ;;  %v56_v31 = vsel %vm40_vm4, %v34_v11, 0.0  ;;  %v50_v36 = vsel %vm40_vm4, 0.25, %v225_v35 }
  0x85   :  { %v53_v33 = vmul.f32 %v52_v30, %v52_v30  ;;  %v57_v34 = vsub.f32 %v55_v28, %v56_v31 }
  0x87   :  { %v54_v37 = vmul.f32 %v53_v33, %v50_v36  ;;  %v67_v38 = vadd.f32 %v66_v32, %v57_v34 }
  0x89   :  { %v68_v39 = vmul.f32 %v67_v38, %v54_v37 }
  0x8b   :  { %v70_v40 = vsel %vm69_vm5, %v68_v39, 0.0 }
  0x8c   :  { %71 = vadd.xlane.f32.xlu0 %v70_v40 }
  0x8d   :  { %187 = shalt.err (!%p184_p4)
}
  0x8e   :  { %s188_s17 = scalar_lea.hbm %s343_s8, 128 }
  0x8f   :  { %p189_p5 = scmp.ne.s32.totalorder %s343_s8, %s188_s17  ;;  %p192_p6 = scmp.lt.u32.totalorder %s188_s17, %s343_s8 }
  0x91   :  { %p194_p7 = pnand %p192_p6, %p189_p5 }
  0x93   :  { %197 = shalt.err (!%p194_p7)
}
  0x94   :  { %140 = dma.vmem_to_hbm [thread:$0]  %s138_s14, 128, %s343_s8, [#allocation4]  }
  0x95   :  { %s198_s29 = scalar_lea.hbm %s341_s6, 16 }
  0x96   :  { %p199_p8 = scmp.ne.s32.totalorder %s341_s6, %s198_s29  ;;  %p202_p9 = scmp.lt.u32.totalorder %s198_s29, %s341_s6 }
  0x98   :  { %p204_p10 = pnand %p202_p9, %p199_p8 }
  0x99   :  { %v101_v45 = vpop.xlane.xlu1 %100 }
  0x9a   :  { %v102_v46 = vrot.slane %v101_v45, 4 }
  0x9c   :  { %v103_v47 = vadd.f32 %v102_v46, %v101_v45 }
  0x9e   :  { %v104_v48 = vrot.slane %v103_v47, 2 }
  0xa0   :  { %v105_v52 = vadd.f32 %v104_v48, %v103_v47 }
  0xa2   :  { %v106_v55 = vrot.slane %v105_v52, 1 }
  0xa4   :  { %v107_v58 = vadd.f32 %v106_v55, %v105_v52 }
 0x119   :  { %v72_v49 = vpop.xlane.xlu0 %71 }
 0x11a   :  { %v73_v50 = vrot.slane %v72_v49, 4 }
 0x11c   :  { %v74_v51 = vadd.f32 %v73_v50, %v72_v49 }
 0x11e   :  { %v75_v53 = vrot.slane %v74_v51, 2 }
 0x120   :  { %v76_v54 = vadd.f32 %v75_v53, %v74_v51 }
 0x122   :  { %v77_v56 = vrot.slane %v76_v54, 1 }
 0x124   :  { %v78_v57 = vadd.f32 %v77_v56, %v76_v54 }
 0x126   :  { %158 = vpush %v78_v57 }
 0x127   :  { %160 = vpush %v107_v58 }
 0x157   :  { %s159_s24 = spop %158 }
 0x158   :  { %s80_s8 = smul.f32 %s159_s24, %s293_s12  ;;  %s161_s25 = spop %160 }
 0x159   :  { %s109_s26 = smul.f32 %s161_s25, %s293_s12 }
 0x15a   :  { %82 = sst [smem:[#allocation3]] %s80_s8 }
 0x15b   :  { %207 = shalt.err (!%p204_p10)
}
 0x15c   :  { %s227_s11 = smov [#allocation3]   ;;  %111 = sst [smem:[#allocation6]] %s109_s26 }
 0x15d   :  { %122 = dma.smem_to_hbm %s227_s11, 16, %s341_s6, [#allocation5]  }
 0x15e   :  { %s208_s12 = scalar_lea.hbm %s342_s7, 16 }
 0x15f   :  { %p209_p11 = scmp.ne.s32.totalorder %s342_s7, %s208_s12  ;;  %p212_p12 = scmp.lt.u32.totalorder %s208_s12, %s342_s7 }
 0x161   :  { %p214_p13 = pnand %p212_p12, %p209_p11 }
 0x163   :  { %217 = shalt.err (!%p214_p13)
}
 0x164   :  { %s228_s16 = smov [#allocation6]  }
 0x165   :  { %130 = dma.smem_to_hbm %s228_s16, 16, %s342_s7, [#allocation7]  }
 0x166   :  { %218 = dma.done.wait [#allocation5], 16  }
 0x167   :  { %219 = vsyncadd [#allocation5], 4294967280 }
 0x168   :  { %220 = dma.done.wait [#allocation7], 16  }
 0x169   :  { %221 = vsyncadd [#allocation7], 4294967280 }
 0x16a   :  { %222 = dma.done.wait [#allocation4], 128  }
 0x16b   :  { %223 = vsyncadd [#allocation4], 4294967168 }
 0x16c   :  { %150 = sfence }
 0x16d   :  { %151 = vsyncpa [#allocation4], 1 }
 0x16e   :  { %152 = vsyncpa [#allocation5], 1 }
 0x16f   :  { %153 = vsyncpa [#allocation7], 1 }

</bundles_post_ra>
